<compile_context>
chip_gen: v7x
topology: tpu7x:2x2x1
jax: 0.10.0
libtpu: 0.0.40
codegen_flags: <defaults>
</compile_context>

<pallas_src>
import functools

import numpy as np
import jax
import jax.numpy as jnp
from jax.experimental import pallas as pl
from jax.experimental.pallas import tpu as pltpu


# -----------------------------------------------------------------------------
# Fused kernel: conv3x3 (single K=9*Cin matmul) + folded-BN + ReLU + GAP + FC.
#
# grid = (B,); one batch element per step.
#   x_ref     : [1, Cin, H, W]     f32   raw NCHW image (read from HBM once)
#   w_ref     : [Cout, 9*Cin]      bf16  conv taps, (ky, kx) major / cin minor
#   scale_ref : [Cout, 1]          f32   gamma / sqrt(var + eps)
#   shift_ref : [Cout, 1]          f32   beta - mean * scale
#   hw_ref    : [NC, Cout]         f32   head weight (torch Linear layout)
#   hb_ref    : [NC, 1]            f32   head bias
#   mask_ref  : [1, band_h*(W+2)]  f32   1.0 on valid columns, 0.0 on junk cols
#   o_ref     : [1, NC, 1]         f32   logits for this batch element
#   xflat_ref : [Cin, (H+3)*(W+2)] f32   scratch: flattened zero-padded image
# -----------------------------------------------------------------------------
def _fused_stem_head_kernel(x_ref, w_ref, scale_ref, shift_ref, hw_ref, hb_ref,
                            mask_ref, o_ref, xflat_ref, *,
                            H, W, Cin, Cout, band_h, n_bands, inv_hw):
    Wp = W + 2                      # padded row pitch
    Mp = band_h * Wp                # matmul N per band (incl. 2 junk cols / row)

    # ---- in-kernel zero pad: flatten padded image row-major into VMEM --------
    # Pitch Wp makes every 3x3 tap below ONE contiguous static lane slice (no
    # per-tap reshape / relayout). Re-zero each step so halo + slack are valid
    # no matter which TensorCore runs this grid index.
    xflat_ref[...] = jnp.zeros((Cin, (H + 3) * Wp), jnp.float32)
    # TODO(synk): for very large H, replace this unrolled fill with a strided DMA.
    for r in range(H):
        off = (r + 1) * Wp + 1
        xflat_ref[:, off:off + W] = x_ref[0, :, r, :]

    # ---- conv3x3 as ONE matmul per band: [Cout, 9*Cin] @ [9*Cin, Mp] ---------
    gap = jnp.zeros((Cout, 1), jnp.float32)
    for bi in range(n_bands):       # static; single band for small images
        r0 = bi * band_h
        taps = [
            xflat_ref[:, (r0 + ky) * Wp + kx:(r0 + ky) * Wp + kx + Mp]
            for ky in range(3) for kx in range(3)
        ]
        lhs = jnp.concatenate(taps, axis=0).astype(jnp.bfloat16)   # [9*Cin, Mp]
        acc = jnp.dot(w_ref[...], lhs,
                      preferred_element_type=jnp.float32)          # [Cout, Mp]
        # folded-BN + ReLU epilogue in f32; mask zeroes the junk columns so they
        # never reach the global-average pool.
        y = jnp.maximum(acc * scale_ref[...] + shift_ref[...], 0.0) * mask_ref[...]
        gap = gap + jnp.sum(y, axis=1, keepdims=True)              # [Cout, 1]

    # ---- global average pool + linear head ------------------------------------
    pooled = gap * inv_hw                                           # [Cout, 1]
    logits = jnp.dot(hw_ref[...], pooled,
                     preferred_element_type=jnp.float32) + hb_ref[...]
    o_ref[0] = logits                                               # [NC, 1]


@jax.jit
def timm_model_forward(x_nchw, params):
    """Forward pass. x_nchw: [B, Cin, H, W] float32 -> logits [B, num_classes]."""
    conv_w = params["conv_w"]          # [Cout, 9*Cin] bf16
    bn_scale = params["bn_scale"]      # [Cout, 1] f32
    bn_shift = params["bn_shift"]      # [Cout, 1] f32
    head_w = params["head_w"]          # [NC, Cout] f32
    head_b = params["head_b"]          # [NC, 1] f32

    B, Cin, H, W = x_nchw.shape
    Cout = conv_w.shape[0]
    NC = head_w.shape[0]
    Wp = W + 2

    # Row banding bounds the in-kernel LHS / activation working set for large
    # images; the 16x16 demo runs as a single band (matmul N = 16*18 = 288).
    max_band_m = 4096
    band_h = H if H * Wp <= max_band_m else max(1, max_band_m // Wp)
    while H % band_h:
        band_h -= 1
    n_bands = H // band_h
    Mp = band_h * Wp

    # Valid-column mask (kills the 2 out-of-row columns per padded-pitch row).
    mask = jnp.asarray((np.arange(Mp) % Wp < W).astype(np.float32).reshape(1, Mp))

    kernel = functools.partial(
        _fused_stem_head_kernel,
        H=H, W=W, Cin=Cin, Cout=Cout, band_h=band_h, n_bands=n_bands,
        inv_hw=1.0 / float(H * W))

    out = pl.pallas_call(
        kernel,
        out_shape=jax.ShapeDtypeStruct((B, NC, 1), jnp.float32),
        grid_spec=pltpu.PrefetchScalarGridSpec(
            num_scalar_prefetch=0,
            # TODO(synk): for B == 1 on v7x, split the band axis across the two
            # TensorCores with per-core partial GAP outputs.
            grid=(B,),
            in_specs=[
                pl.BlockSpec((1, Cin, H, W), lambda b: (b, 0, 0, 0)),
                pl.BlockSpec((Cout, 9 * Cin), lambda b: (0, 0)),
                pl.BlockSpec((Cout, 1), lambda b: (0, 0)),
                pl.BlockSpec((Cout, 1), lambda b: (0, 0)),
                pl.BlockSpec((NC, Cout), lambda b: (0, 0)),
                pl.BlockSpec((NC, 1), lambda b: (0, 0)),
                pl.BlockSpec((1, Mp), lambda b: (0, 0)),
            ],
            out_specs=pl.BlockSpec((1, NC, 1), lambda b: (b, 0, 0)),
            scratch_shapes=[pltpu.VMEM((Cin, (H + 3) * Wp), jnp.float32)],
        ),
        compiler_params=pltpu.CompilerParams(
            # batch elements across v7x's two TensorCores; no vmem_limit override
            # (default headroom is plenty: the working set here is a few KiB).
            dimension_semantics=("parallel",),
        ),
    )(x_nchw, conv_w, bn_scale, bn_shift, head_w, head_b, mask)

    return out[:, :, 0]


def init_params(key, cin=4, cout=32, num_classes=10):
    """Deterministic synthetic parameters (timm-style conv-bn-relu-gap-fc)."""
    k1, k2, k3, k4, k5, k6 = jax.random.split(key, 6)
    # torch-style conv weight [Cout, Cin, 3, 3] -> kernel matmul layout
    # [Cout, 9*Cin] with (ky, kx) major / cin minor column order.
    w_torch = jax.random.normal(k1, (cout, cin, 3, 3), jnp.float32) * 0.1
    conv_w = jnp.transpose(w_torch, (0, 2, 3, 1)).reshape(cout, 9 * cin)
    gamma = 1.0 + 0.1 * jax.random.normal(k2, (cout,), jnp.float32)
    beta = 0.1 * jax.random.normal(k3, (cout,), jnp.float32)
    running_mean = 0.05 * jax.random.normal(k4, (cout,), jnp.float32)
    running_var = jnp.abs(1.0 + 0.1 * jax.random.normal(k5, (cout,), jnp.float32))
    eps = 1e-5
    scale = gamma / jnp.sqrt(running_var + eps)
    shift = beta - running_mean * scale
    head_w = jax.random.normal(k6, (num_classes, cout), jnp.float32) * 0.05
    head_b = jnp.zeros((num_classes,), jnp.float32)
    return {
        "conv_w": conv_w.astype(jnp.bfloat16),        # [Cout, 9*Cin] bf16
        "bn_scale": scale.reshape(cout, 1),           # [Cout, 1] f32
        "bn_shift": shift.reshape(cout, 1),           # [Cout, 1] f32
        "head_w": head_w,                             # [NC, Cout] f32
        "head_b": head_b.reshape(num_classes, 1),     # [NC, 1] f32
    }


if __name__ == "__main__":
    key = jax.random.PRNGKey(0)
    kx_, kp_ = jax.random.split(key)

    B, Cin, H, W = 2, 4, 16, 16   # small NCHW image batch, like the torch module
    Cout, num_classes = 32, 10

    x = jax.random.normal(kx_, (B, Cin, H, W), jnp.float32)
    params = init_params(kp_, cin=Cin, cout=Cout, num_classes=num_classes)

    logits = timm_model_forward(x, params)
    logits = jax.block_until_ready(logits)

    assert logits.shape == (B, num_classes)
    assert logits.dtype == jnp.float32

    # ---- plain-JAX reference of the same forward (same bf16-rounded operands) ----
    xq = jnp.pad(x, ((0, 0), (0, 0), (1, 1), (1, 1))
                 ).astype(jnp.bfloat16).astype(jnp.float32)       # [B,Cin,H+2,W+2]
    wq = params["conv_w"].astype(jnp.float32).reshape(Cout, 3, 3, Cin)
    taps = [xq[:, :, ky:ky + H, kxx:kxx + W]
            for ky in range(3) for kxx in range(3)]
    patches = jnp.stack(taps, axis=1).reshape(B, 3, 3, Cin, H, W)
    feat = jnp.einsum("byxchw,oyxc->bohw", patches, wq,
                      precision=jax.lax.Precision.HIGHEST)
    feat = jnp.maximum(
        feat * params["bn_scale"].reshape(1, Cout, 1, 1)
        + params["bn_shift"].reshape(1, Cout, 1, 1), 0.0)
    pooled = feat.mean(axis=(2, 3))                               # [B, Cout]
    ref_logits = jnp.dot(pooled, params["head_w"].T,
                         precision=jax.lax.Precision.HIGHEST) + params["head_b"][:, 0]

    assert jnp.allclose(logits, ref_logits, atol=2e-3, rtol=2e-3), (
        jnp.max(jnp.abs(logits - ref_logits)))

    print("KERNEL_OK")
</pallas_src>

<mosaic_0001>
module attributes {stable_mosaic.version = 11 : i64} {
  func.func @_fused_stem_head_kernel(%arg0: i32, %arg1: memref<1x4x16x16xf32, #tpu.memory_space<vmem>>, %arg2: memref<32x36xbf16, #tpu.memory_space<vmem>>, %arg3: memref<32x1xf32, #tpu.memory_space<vmem>>, %arg4: memref<32x1xf32, #tpu.memory_space<vmem>>, %arg5: memref<10x32xf32, #tpu.memory_space<vmem>>, %arg6: memref<10x1xf32, #tpu.memory_space<vmem>>, %arg7: memref<1x288xf32, #tpu.memory_space<vmem>>, %arg8: memref<1x10x1xf32, #tpu.memory_space<vmem>>, %arg9: memref<4x342xf32, #tpu.memory_space<vmem>>) attributes {dimension_semantics = [#tpu.dimension_semantics<parallel>], iteration_bounds = array<i64: 2>, scalar_prefetch = 0 : i64, scratch_operands = 1 : i64, tpu.core_type = #tpu.core_type<tc>, window_params = [{transform_indices = @transform_0, window_bounds = array<i64: 1, 4, 16, 16>}, {pipeline_mode = #tpu.pipeline_mode<synchronous>, transform_indices = @transform_1, window_bounds = array<i64: 32, 36>}, {pipeline_mode = #tpu.pipeline_mode<synchronous>, transform_indices = @transform_2, window_bounds = array<i64: 32, 1>}, {pipeline_mode = #tpu.pipeline_mode<synchronous>, transform_indices = @transform_3, window_bounds = array<i64: 32, 1>}, {pipeline_mode = #tpu.pipeline_mode<synchronous>, transform_indices = @transform_4, window_bounds = array<i64: 10, 32>}, {pipeline_mode = #tpu.pipeline_mode<synchronous>, transform_indices = @transform_5, window_bounds = array<i64: 10, 1>}, {pipeline_mode = #tpu.pipeline_mode<synchronous>, transform_indices = @transform_6, window_bounds = array<i64: 1, 288>}, {transform_indices = @transform_7, window_bounds = array<i64: 1, 10, 1>}]} {
    %cst = arith.constant 0.000000e+00 : f32
    %0 = vector.broadcast %cst : f32 to vector<4x342xf32>
    %c0 = arith.constant 0 : index
    %c0_0 = arith.constant 0 : index
    %1 = vector.load %arg9[%c0, %c0_0] : memref<4x342xf32, #tpu.memory_space<vmem>>, vector<4x342xf32>
    tpu.vector_store %arg9[%c0, %c0_0], %0 {strides = array<i32>} : memref<4x342xf32, #tpu.memory_space<vmem>>, vector<4x342xf32>,
    %c0_1 = arith.constant 0 : index
    %c0_2 = arith.constant 0 : index
    %c0_3 = arith.constant 0 : index
    %c0_4 = arith.constant 0 : index
    %2 = vector.load %arg1[%c0_1, %c0_2, %c0_3, %c0_4] : memref<1x4x16x16xf32, #tpu.memory_space<vmem>>, vector<1x4x1x16xf32>
    %3 = vector.shape_cast %2 : vector<1x4x1x16xf32> to vector<4x16xf32>
    %c0_5 = arith.constant 0 : index
    %c19 = arith.constant 19 : index
    %4 = vector.load %arg9[%c0_5, %c19] : memref<4x342xf32, #tpu.memory_space<vmem>>, vector<4x16xf32>
    tpu.vector_store %arg9[%c0_5, %c19], %3 {strides = array<i32>} : memref<4x342xf32, #tpu.memory_space<vmem>>, vector<4x16xf32>,
    %c0_6 = arith.constant 0 : index
    %c0_7 = arith.constant 0 : index
    %c1 = arith.constant 1 : index
    %c0_8 = arith.constant 0 : index
    %5 = vector.load %arg1[%c0_6, %c0_7, %c1, %c0_8] : memref<1x4x16x16xf32, #tpu.memory_space<vmem>>, vector<1x4x1x16xf32>
    %6 = vector.shape_cast %5 : vector<1x4x1x16xf32> to vector<4x16xf32>
    %c0_9 = arith.constant 0 : index
    %c37 = arith.constant 37 : index
    %7 = vector.load %arg9[%c0_9, %c37] : memref<4x342xf32, #tpu.memory_space<vmem>>, vector<4x16xf32>
    tpu.vector_store %arg9[%c0_9, %c37], %6 {strides = array<i32>} : memref<4x342xf32, #tpu.memory_space<vmem>>, vector<4x16xf32>,
    %c0_10 = arith.constant 0 : index
    %c0_11 = arith.constant 0 : index
    %c2 = arith.constant 2 : index
    %c0_12 = arith.constant 0 : index
    %8 = vector.load %arg1[%c0_10, %c0_11, %c2, %c0_12] : memref<1x4x16x16xf32, #tpu.memory_space<vmem>>, vector<1x4x1x16xf32>
    %9 = vector.shape_cast %8 : vector<1x4x1x16xf32> to vector<4x16xf32>
    %c0_13 = arith.constant 0 : index
    %c55 = arith.constant 55 : index
    %10 = vector.load %arg9[%c0_13, %c55] : memref<4x342xf32, #tpu.memory_space<vmem>>, vector<4x16xf32>
    tpu.vector_store %arg9[%c0_13, %c55], %9 {strides = array<i32>} : memref<4x342xf32, #tpu.memory_space<vmem>>, vector<4x16xf32>,
    %c0_14 = arith.constant 0 : index
    %c0_15 = arith.constant 0 : index
    %c3 = arith.constant 3 : index
    %c0_16 = arith.constant 0 : index
    %11 = vector.load %arg1[%c0_14, %c0_15, %c3, %c0_16] : memref<1x4x16x16xf32, #tpu.memory_space<vmem>>, vector<1x4x1x16xf32>
    %12 = vector.shape_cast %11 : vector<1x4x1x16xf32> to vector<4x16xf32>
    %c0_17 = arith.constant 0 : index
    %c73 = arith.constant 73 : index
    %13 = vector.load %arg9[%c0_17, %c73] : memref<4x342xf32, #tpu.memory_space<vmem>>, vector<4x16xf32>
    tpu.vector_store %arg9[%c0_17, %c73], %12 {strides = array<i32>} : memref<4x342xf32, #tpu.memory_space<vmem>>, vector<4x16xf32>,
    %c0_18 = arith.constant 0 : index
    %c0_19 = arith.constant 0 : index
    %c4 = arith.constant 4 : index
    %c0_20 = arith.constant 0 : index
    %14 = vector.load %arg1[%c0_18, %c0_19, %c4, %c0_20] : memref<1x4x16x16xf32, #tpu.memory_space<vmem>>, vector<1x4x1x16xf32>
    %15 = vector.shape_cast %14 : vector<1x4x1x16xf32> to vector<4x16xf32>
    %c0_21 = arith.constant 0 : index
    %c91 = arith.constant 91 : index
    %16 = vector.load %arg9[%c0_21, %c91] : memref<4x342xf32, #tpu.memory_space<vmem>>, vector<4x16xf32>
    tpu.vector_store %arg9[%c0_21, %c91], %15 {strides = array<i32>} : memref<4x342xf32, #tpu.memory_space<vmem>>, vector<4x16xf32>,
    %c0_22 = arith.constant 0 : index
    %c0_23 = arith.constant 0 : index
    %c5 = arith.constant 5 : index
    %c0_24 = arith.constant 0 : index
    %17 = vector.load %arg1[%c0_22, %c0_23, %c5, %c0_24] : memref<1x4x16x16xf32, #tpu.memory_space<vmem>>, vector<1x4x1x16xf32>
    %18 = vector.shape_cast %17 : vector<1x4x1x16xf32> to vector<4x16xf32>
    %c0_25 = arith.constant 0 : index
    %c109 = arith.constant 109 : index
    %19 = vector.load %arg9[%c0_25, %c109] : memref<4x342xf32, #tpu.memory_space<vmem>>, vector<4x16xf32>
    tpu.vector_store %arg9[%c0_25, %c109], %18 {strides = array<i32>} : memref<4x342xf32, #tpu.memory_space<vmem>>, vector<4x16xf32>,
    %c0_26 = arith.constant 0 : index
    %c0_27 = arith.constant 0 : index
    %c6 = arith.constant 6 : index
    %c0_28 = arith.constant 0 : index
    %20 = vector.load %arg1[%c0_26, %c0_27, %c6, %c0_28] : memref<1x4x16x16xf32, #tpu.memory_space<vmem>>, vector<1x4x1x16xf32>
    %21 = vector.shape_cast %20 : vector<1x4x1x16xf32> to vector<4x16xf32>
    %c0_29 = arith.constant 0 : index
    %c127 = arith.constant 127 : index
    %22 = vector.load %arg9[%c0_29, %c127] : memref<4x342xf32, #tpu.memory_space<vmem>>, vector<4x16xf32>
    tpu.vector_store %arg9[%c0_29, %c127], %21 {strides = array<i32>} : memref<4x342xf32, #tpu.memory_space<vmem>>, vector<4x16xf32>,
    %c0_30 = arith.constant 0 : index
    %c0_31 = arith.constant 0 : index
    %c7 = arith.constant 7 : index
    %c0_32 = arith.constant 0 : index
    %23 = vector.load %arg1[%c0_30, %c0_31, %c7, %c0_32] : memref<1x4x16x16xf32, #tpu.memory_space<vmem>>, vector<1x4x1x16xf32>
    %24 = vector.shape_cast %23 : vector<1x4x1x16xf32> to vector<4x16xf32>
    %c0_33 = arith.constant 0 : index
    %c145 = arith.constant 145 : index
    %25 = vector.load %arg9[%c0_33, %c145] : memref<4x342xf32, #tpu.memory_space<vmem>>, vector<4x16xf32>
    tpu.vector_store %arg9[%c0_33, %c145], %24 {strides = array<i32>} : memref<4x342xf32, #tpu.memory_space<vmem>>, vector<4x16xf32>,
    %c0_34 = arith.constant 0 : index
    %c0_35 = arith.constant 0 : index
    %c8 = arith.constant 8 : index
    %c0_36 = arith.constant 0 : index
    %26 = vector.load %arg1[%c0_34, %c0_35, %c8, %c0_36] : memref<1x4x16x16xf32, #tpu.memory_space<vmem>>, vector<1x4x1x16xf32>
    %27 = vector.shape_cast %26 : vector<1x4x1x16xf32> to vector<4x16xf32>
    %c0_37 = arith.constant 0 : index
    %c163 = arith.constant 163 : index
    %28 = vector.load %arg9[%c0_37, %c163] : memref<4x342xf32, #tpu.memory_space<vmem>>, vector<4x16xf32>
    tpu.vector_store %arg9[%c0_37, %c163], %27 {strides = array<i32>} : memref<4x342xf32, #tpu.memory_space<vmem>>, vector<4x16xf32>,
    %c0_38 = arith.constant 0 : index
    %c0_39 = arith.constant 0 : index
    %c9 = arith.constant 9 : index
    %c0_40 = arith.constant 0 : index
    %29 = vector.load %arg1[%c0_38, %c0_39, %c9, %c0_40] : memref<1x4x16x16xf32, #tpu.memory_space<vmem>>, vector<1x4x1x16xf32>
    %30 = vector.shape_cast %29 : vector<1x4x1x16xf32> to vector<4x16xf32>
    %c0_41 = arith.constant 0 : index
    %c181 = arith.constant 181 : index
    %31 = vector.load %arg9[%c0_41, %c181] : memref<4x342xf32, #tpu.memory_space<vmem>>, vector<4x16xf32>
    tpu.vector_store %arg9[%c0_41, %c181], %30 {strides = array<i32>} : memref<4x342xf32, #tpu.memory_space<vmem>>, vector<4x16xf32>,
    %c0_42 = arith.constant 0 : index
    %c0_43 = arith.constant 0 : index
    %c10 = arith.constant 10 : index
    %c0_44 = arith.constant 0 : index
    %32 = vector.load %arg1[%c0_42, %c0_43, %c10, %c0_44] : memref<1x4x16x16xf32, #tpu.memory_space<vmem>>, vector<1x4x1x16xf32>
    %33 = vector.shape_cast %32 : vector<1x4x1x16xf32> to vector<4x16xf32>
    %c0_45 = arith.constant 0 : index
    %c199 = arith.constant 199 : index
    %34 = vector.load %arg9[%c0_45, %c199] : memref<4x342xf32, #tpu.memory_space<vmem>>, vector<4x16xf32>
    tpu.vector_store %arg9[%c0_45, %c199], %33 {strides = array<i32>} : memref<4x342xf32, #tpu.memory_space<vmem>>, vector<4x16xf32>,
    %c0_46 = arith.constant 0 : index
    %c0_47 = arith.constant 0 : index
    %c11 = arith.constant 11 : index
    %c0_48 = arith.constant 0 : index
    %35 = vector.load %arg1[%c0_46, %c0_47, %c11, %c0_48] : memref<1x4x16x16xf32, #tpu.memory_space<vmem>>, vector<1x4x1x16xf32>
    %36 = vector.shape_cast %35 : vector<1x4x1x16xf32> to vector<4x16xf32>
    %c0_49 = arith.constant 0 : index
    %c217 = arith.constant 217 : index
    %37 = vector.load %arg9[%c0_49, %c217] : memref<4x342xf32, #tpu.memory_space<vmem>>, vector<4x16xf32>
    tpu.vector_store %arg9[%c0_49, %c217], %36 {strides = array<i32>} : memref<4x342xf32, #tpu.memory_space<vmem>>, vector<4x16xf32>,
    %c0_50 = arith.constant 0 : index
    %c0_51 = arith.constant 0 : index
    %c12 = arith.constant 12 : index
    %c0_52 = arith.constant 0 : index
    %38 = vector.load %arg1[%c0_50, %c0_51, %c12, %c0_52] : memref<1x4x16x16xf32, #tpu.memory_space<vmem>>, vector<1x4x1x16xf32>
    %39 = vector.shape_cast %38 : vector<1x4x1x16xf32> to vector<4x16xf32>
    %c0_53 = arith.constant 0 : index
    %c235 = arith.constant 235 : index
    %40 = vector.load %arg9[%c0_53, %c235] : memref<4x342xf32, #tpu.memory_space<vmem>>, vector<4x16xf32>
    tpu.vector_store %arg9[%c0_53, %c235], %39 {strides = array<i32>} : memref<4x342xf32, #tpu.memory_space<vmem>>, vector<4x16xf32>,
    %c0_54 = arith.constant 0 : index
    %c0_55 = arith.constant 0 : index
    %c13 = arith.constant 13 : index
    %c0_56 = arith.constant 0 : index
    %41 = vector.load %arg1[%c0_54, %c0_55, %c13, %c0_56] : memref<1x4x16x16xf32, #tpu.memory_space<vmem>>, vector<1x4x1x16xf32>
    %42 = vector.shape_cast %41 : vector<1x4x1x16xf32> to vector<4x16xf32>
    %c0_57 = arith.constant 0 : index
    %c253 = arith.constant 253 : index
    %43 = vector.load %arg9[%c0_57, %c253] : memref<4x342xf32, #tpu.memory_space<vmem>>, vector<4x16xf32>
    tpu.vector_store %arg9[%c0_57, %c253], %42 {strides = array<i32>} : memref<4x342xf32, #tpu.memory_space<vmem>>, vector<4x16xf32>,
    %c0_58 = arith.constant 0 : index
    %c0_59 = arith.constant 0 : index
    %c14 = arith.constant 14 : index
    %c0_60 = arith.constant 0 : index
    %44 = vector.load %arg1[%c0_58, %c0_59, %c14, %c0_60] : memref<1x4x16x16xf32, #tpu.memory_space<vmem>>, vector<1x4x1x16xf32>
    %45 = vector.shape_cast %44 : vector<1x4x1x16xf32> to vector<4x16xf32>
    %c0_61 = arith.constant 0 : index
    %c271 = arith.constant 271 : index
    %46 = vector.load %arg9[%c0_61, %c271] : memref<4x342xf32, #tpu.memory_space<vmem>>, vector<4x16xf32>
    tpu.vector_store %arg9[%c0_61, %c271], %45 {strides = array<i32>} : memref<4x342xf32, #tpu.memory_space<vmem>>, vector<4x16xf32>,
    %c0_62 = arith.constant 0 : index
    %c0_63 = arith.constant 0 : index
    %c15 = arith.constant 15 : index
    %c0_64 = arith.constant 0 : index
    %47 = vector.load %arg1[%c0_62, %c0_63, %c15, %c0_64] : memref<1x4x16x16xf32, #tpu.memory_space<vmem>>, vector<1x4x1x16xf32>
    %48 = vector.shape_cast %47 : vector<1x4x1x16xf32> to vector<4x16xf32>
    %c0_65 = arith.constant 0 : index
    %c289 = arith.constant 289 : index
    %49 = vector.load %arg9[%c0_65, %c289] : memref<4x342xf32, #tpu.memory_space<vmem>>, vector<4x16xf32>
    tpu.vector_store %arg9[%c0_65, %c289], %48 {strides = array<i32>} : memref<4x342xf32, #tpu.memory_space<vmem>>, vector<4x16xf32>,
    %cst_66 = arith.constant 0.000000e+00 : f32
    %50 = vector.broadcast %cst_66 : f32 to vector<32x1xf32>
    %c0_67 = arith.constant 0 : index
    %c0_68 = arith.constant 0 : index
    %51 = vector.load %arg9[%c0_67, %c0_68] : memref<4x342xf32, #tpu.memory_space<vmem>>, vector<4x288xf32>
    %c0_69 = arith.constant 0 : index
    %c1_70 = arith.constant 1 : index
    %52 = vector.load %arg9[%c0_69, %c1_70] : memref<4x342xf32, #tpu.memory_space<vmem>>, vector<4x288xf32>
    %c0_71 = arith.constant 0 : index
    %c2_72 = arith.constant 2 : index
    %53 = vector.load %arg9[%c0_71, %c2_72] : memref<4x342xf32, #tpu.memory_space<vmem>>, vector<4x288xf32>
    %c0_73 = arith.constant 0 : index
    %c18 = arith.constant 18 : index
    %54 = vector.load %arg9[%c0_73, %c18] : memref<4x342xf32, #tpu.memory_space<vmem>>, vector<4x288xf32>
    %c0_74 = arith.constant 0 : index
    %c19_75 = arith.constant 19 : index
    %55 = vector.load %arg9[%c0_74, %c19_75] : memref<4x342xf32, #tpu.memory_space<vmem>>, vector<4x288xf32>
    %c0_76 = arith.constant 0 : index
    %c20 = arith.constant 20 : index
    %56 = vector.load %arg9[%c0_76, %c20] : memref<4x342xf32, #tpu.memory_space<vmem>>, vector<4x288xf32>
    %c0_77 = arith.constant 0 : index
    %c36 = arith.constant 36 : index
    %57 = vector.load %arg9[%c0_77, %c36] : memref<4x342xf32, #tpu.memory_space<vmem>>, vector<4x288xf32>
    %c0_78 = arith.constant 0 : index
    %c37_79 = arith.constant 37 : index
    %58 = vector.load %arg9[%c0_78, %c37_79] : memref<4x342xf32, #tpu.memory_space<vmem>>, vector<4x288xf32>
    %c0_80 = arith.constant 0 : index
    %c38 = arith.constant 38 : index
    %59 = vector.load %arg9[%c0_80, %c38] : memref<4x342xf32, #tpu.memory_space<vmem>>, vector<4x288xf32>
    %60 = tpu.concatenate %51, %52, %53, %54, %55, %56, %57, %58, %59 in 0 : vector<4x288xf32>, vector<4x288xf32>, vector<4x288xf32>, vector<4x288xf32>, vector<4x288xf32>, vector<4x288xf32>, vector<4x288xf32>, vector<4x288xf32>, vector<4x288xf32> -> vector<36x288xf32>
    %61 = arith.truncf %60 : vector<36x288xf32> to vector<36x288xbf16>
    %c0_81 = arith.constant 0 : index
    %c0_82 = arith.constant 0 : index
    %62 = vector.load %arg2[%c0_81, %c0_82] : memref<32x36xbf16, #tpu.memory_space<vmem>>, vector<32x36xbf16>
    %cst_83 = arith.constant dense<0.000000e+00> : vector<32x288xf32>
    %63 = tpu.matmul %62, %61, %cst_83 {dimension_numbers = #tpu.dot_dimension_numbers<[1], [0], [0], [1], [0, 0, 1, 1], [], []>} : vector<32x36xbf16>, vector<36x288xbf16>, vector<32x288xf32> -> vector<32x288xf32>
    %c0_84 = arith.constant 0 : index
    %c0_85 = arith.constant 0 : index
    %64 = vector.load %arg3[%c0_84, %c0_85] : memref<32x1xf32, #tpu.memory_space<vmem>>, vector<32x1xf32>
    %65 = vector.broadcast %64 : vector<32x1xf32> to vector<32x288xf32>
    %66 = arith.mulf %63, %65 : vector<32x288xf32>
    %c0_86 = arith.constant 0 : index
    %c0_87 = arith.constant 0 : index
    %67 = vector.load %arg4[%c0_86, %c0_87] : memref<32x1xf32, #tpu.memory_space<vmem>>, vector<32x1xf32>
    %68 = vector.broadcast %67 : vector<32x1xf32> to vector<32x288xf32>
    %69 = arith.addf %66, %68 : vector<32x288xf32>
    %cst_88 = arith.constant 0.000000e+00 : f32
    %70 = vector.broadcast %cst_88 : f32 to vector<32x288xf32>
    %71 = arith.maximumf %69, %70 : vector<32x288xf32>
    %c0_89 = arith.constant 0 : index
    %c0_90 = arith.constant 0 : index
    %72 = vector.load %arg7[%c0_89, %c0_90] : memref<1x288xf32, #tpu.memory_space<vmem>>, vector<1x288xf32>
    %73 = vector.broadcast %72 : vector<1x288xf32> to vector<32x288xf32>
    %74 = arith.mulf %71, %73 : vector<32x288xf32>
    %cst_91 = arith.constant dense<0.000000e+00> : vector<32xf32>
    %75 = vector.multi_reduction <add>, %74, %cst_91 [1] : vector<32x288xf32> to vector<32xf32>
    %76 = vector.shape_cast %75 : vector<32xf32> to vector<32x1xf32>
    %77 = arith.addf %50, %76 : vector<32x1xf32>
    %cst_92 = arith.constant 3.906250e-03 : f32
    %78 = vector.broadcast %cst_92 : f32 to vector<32x1xf32>
    %79 = arith.mulf %77, %78 : vector<32x1xf32>
    %c0_93 = arith.constant 0 : index
    %c0_94 = arith.constant 0 : index
    %80 = vector.load %arg5[%c0_93, %c0_94] : memref<10x32xf32, #tpu.memory_space<vmem>>, vector<10x32xf32>
    %cst_95 = arith.constant dense<0.000000e+00> : vector<10x1xf32>
    %81 = tpu.matmul %80, %79, %cst_95 {dimension_numbers = #tpu.dot_dimension_numbers<[1], [0], [0], [1], [0, 0, 1, 1], [], []>} : vector<10x32xf32>, vector<32x1xf32>, vector<10x1xf32> -> vector<10x1xf32>
    %c0_96 = arith.constant 0 : index
    %c0_97 = arith.constant 0 : index
    %82 = vector.load %arg6[%c0_96, %c0_97] : memref<10x1xf32, #tpu.memory_space<vmem>>, vector<10x1xf32>
    %83 = arith.addf %81, %82 : vector<10x1xf32>
    %c0_98 = arith.constant 0 : index
    %c0_99 = arith.constant 0 : index
    %c0_100 = arith.constant 0 : index
    %84 = vector.load %arg8[%c0_98, %c0_99, %c0_100] : memref<1x10x1xf32, #tpu.memory_space<vmem>>, vector<1x10x1xf32>
    %85 = vector.shape_cast %84 : vector<1x10x1xf32> to vector<10x1xf32>
    %86 = vector.shape_cast %83 : vector<10x1xf32> to vector<1x10x1xf32>
    tpu.vector_store %arg8[%c0_98, %c0_99, %c0_100], %86 {strides = array<i32>} : memref<1x10x1xf32, #tpu.memory_space<vmem>>, vector<1x10x1xf32>,
    return
  }
  func.func @transform_0(%arg0: i32) -> (i32, i32, i32, i32) {
    %c0_i32 = arith.constant 0 : i32
    %c0_i32_0 = arith.constant 0 : i32
    %c0_i32_1 = arith.constant 0 : i32
    %c0_i32_2 = arith.constant 0 : i32
    return %arg0, %c0_i32, %c0_i32_0, %c0_i32_1 : i32, i32, i32, i32
  }
  func.func @transform_1(%arg0: i32) -> (i32, i32) {
    %c0_i32 = arith.constant 0 : i32
    %c0_i32_0 = arith.constant 0 : i32
    %c0_i32_1 = arith.constant 0 : i32
    return %c0_i32, %c0_i32_0 : i32, i32
  }
  func.func @transform_2(%arg0: i32) -> (i32, i32) {
    %c0_i32 = arith.constant 0 : i32
    %c0_i32_0 = arith.constant 0 : i32
    %c0_i32_1 = arith.constant 0 : i32
    return %c0_i32, %c0_i32_0 : i32, i32
  }
  func.func @transform_3(%arg0: i32) -> (i32, i32) {
    %c0_i32 = arith.constant 0 : i32
    %c0_i32_0 = arith.constant 0 : i32
    %c0_i32_1 = arith.constant 0 : i32
    return %c0_i32, %c0_i32_0 : i32, i32
  }
  func.func @transform_4(%arg0: i32) -> (i32, i32) {
    %c0_i32 = arith.constant 0 : i32
    %c0_i32_0 = arith.constant 0 : i32
    %c0_i32_1 = arith.constant 0 : i32
    return %c0_i32, %c0_i32_0 : i32, i32
  }
  func.func @transform_5(%arg0: i32) -> (i32, i32) {
    %c0_i32 = arith.constant 0 : i32
    %c0_i32_0 = arith.constant 0 : i32
    %c0_i32_1 = arith.constant 0 : i32
    return %c0_i32, %c0_i32_0 : i32, i32
  }
  func.func @transform_6(%arg0: i32) -> (i32, i32) {
    %c0_i32 = arith.constant 0 : i32
    %c0_i32_0 = arith.constant 0 : i32
    %c0_i32_1 = arith.constant 0 : i32
    return %c0_i32, %c0_i32_0 : i32, i32
  }
  func.func @transform_7(%arg0: i32) -> (i32, i32, i32) {
    %c0_i32 = arith.constant 0 : i32
    %c0_i32_0 = arith.constant 0 : i32
    %c0_i32_1 = arith.constant 0 : i32
    return %arg0, %c0_i32, %c0_i32_0 : i32, i32, i32
  }
}

</mosaic_0001>

<bundles_post_ra>
// kernel: timm_model_forward.1
= control target key start
LH: loop header
LB: loop body
LE: loop exit
PB: predicated region body
PF: predicated region fallthrough
CT: control target
= control target key end

     0   :  { %12 = vsyncpa [#allocation4], 0  ;;  %s1929_s0 = inlined_call_operand.hbm [shape: f32[2,4,16,16], index: 0, kind: input, shape index: {}]   ;;  %s1930_s1 = inlined_call_operand.vmem [shape: bf16[32,36], index: 1, kind: input, shape index: {}]   ;;  %s1931_s2 = inlined_call_operand.vmem [shape: f32[32,1], index: 2, kind: input, shape index: {}]   ;;  %s1932_s3 = inlined_call_operand.vmem [shape: f32[32,1], index: 3, kind: input, shape index: {}]   ;;  %s1933_s4 = inlined_call_operand.vmem [shape: f32[10,32], index: 4, kind: input, shape index: {}]   ;;  %s1934_s5 = inlined_call_operand.vmem [shape: f32[10,1], index: 5, kind: input, shape index: {}]   ;;  %s1935_s6 = inlined_call_operand.vmem [shape: f32[1,288], index: 6, kind: input, shape index: {}]   ;;  %s1936_s7 = inlined_call_operand.vmem [shape: f32[2,10,1], index: 7, kind: output, shape index: {}]  }
   0x1   :  { %14 = vsyncpa [#allocation4 + $0x1], 0  ;;  %s1534_s24 = smov 0   ;;  %s1536_s25 = smov 0  }
   0x2   :  { %s1538_s26 = smov 0   ;;  %s1540_s27 = smov 0  }
   0x3 LB: > { %s1553_s28 = sadd.s32 4294967295, %s1466_s27   ;;  %s1556_s29 = sadd.s32 1, %s1466_s27   ;;  %s1466_s27 = sphi %s1540_s27, %s1943_s27   ;;  %s1462_s26 = sphi %s1538_s26, %s1942_s26   ;;  %s1458_s25 = sphi %s1536_s25, %s1941_s25   ;;  %s1454_s24 = sphi %s1534_s24, %s1940_s24  }
   0x4   : > { %s24_s30 = ssub.s32 %s1466_s27, %s1556_s29  ;;  %s27_s8 = sadd.s32 1, %s1462_s26 }
   0x5   : > { %p25_p0 = scmp.eq.s32.totalorder %s24_s30, 0  ;;  %p34_p1 = scmp.ne.s32.totalorder %s1462_s26, %s1458_s25 }
   0x6   : > { %p35_p2 = scmp.eq.s32.totalorder %s1466_s27, 0  ;;  %p40_p3 = scmp.ne.s32.totalorder %s1458_s25, %s1454_s24 }
   0x7   : > { %s1566_s9 = scalar_select %p25_p0, %s1462_s26, %s27_s8  }
   0x8   : > { %p36_p4 = por %p35_p2, %p34_p1  ;;  %p41_p5 = scmp.eq.s32.totalorder %s1553_s28, 0 }
   0x9   : > { %p1297_p6 = scmp.lt.s32.totalorder %s1466_s27, 2  ;;  %s234_s11 = sand.u32 1, %s1462_s26  }
   0xa   : > { %p1570_p7 = por %p41_p5, %p40_p3  ;;  %s1230_s12 = sshll.u32 %s234_s11, 6 }
   0xb   : > { %s1248_s13 = sshll.u32 %s1466_s27, 10  ;;  %s238_s17 = scalar_lea.vmem [#allocation3], %s1230_s12 }
   0xc   : > { %s1579_s16 = scalar_lea.hbm %s1929_s0, %s1248_s13  ;;  %s245_s18 = sshll.u32 %s238_s17, 4  ;;  %s1581_s18 = int_to_ptr.vmem [resolvable:$true] %s245_s18 }
   0xd   : > { %p1583_p8 = pnand %p1297_p6, %p36_p4  ;;  %s1588_s20 = scalar_lea.sflag [#allocation4], %s234_s11 }
   0xe   : > { %s1402_s21 = scalar_lea.hbm %s1579_s16, 1024  ;;  %s1407_s24 = scalar_lea.hbm %s1929_s0, 2048 }
   0xf   : > { %p1403_p10 = scmp.ne.s32.totalorder %s1579_s16, %s1402_s21  ;;  %p1404_p11 = pneg %p1583_p8 }
  0x10   : > { %p1408_p0 = scmp.lt.u32.totalorder %s1579_s16, %s1929_s0  ;;  %p1409_p1 = scmp.lt.u32.totalorder %s1407_s24, %s1402_s21 }
  0x11   : > { %p1405_p12 = pnand %p1404_p11, %p1403_p10  ;;  %p1411_p3 = scmp.lt.u32.totalorder %s1402_s21, %s1579_s16 }
  0x12   : > { %p1410_p2 = por %p1409_p1, %p1408_p0 }
  0x13   : > { %p1406_p13 = pneg %p1405_p12 }
  0x14   : > { %p1412_p4 = por %p1411_p3, %p1410_p2 }
  0x16   : > { %p1413_p5 = pnand %p1412_p4, %p1406_p13 }
  0x18   : > { %1416 = shalt.err (!%p1413_p5)
}
  0x19   : > { %s1417_s11 = scalar_lea.vmem %s1581_s18, 1024  ;;  %s1468_s12 = smov [#allocation3]  }
  0x1a   : > { %p1418_p6 = scmp.ne.s32.totalorder %s1581_s18, %s1417_s11  ;;  %s1422_s13 = sshll.u32 %s1468_s12, 4  ;;  %s1423_s13 = int_to_ptr.vmem [resolvable:$false] %s1422_s13 }
  0x1b   : > { %s1424_s14 = scalar_lea.vmem %s1423_s13, 2048  ;;  %p1425_p9 = scmp.lt.s32.totalorder %s1581_s18, %s1423_s13 }
  0x1c   : > { %p1420_p10 = pnand %p1418_p6, %p1404_p11  ;;  %p1426_p0 = scmp.lt.s32.totalorder %s1424_s14, %s1417_s11 }
  0x1e   : > { %p1421_p12 = pneg %p1420_p10  ;;  %p1427_p1 = por %p1426_p0, %p1425_p9 }
  0x20   : > { %p1428_p2 = pnand %p1427_p1, %p1421_p12 }
  0x22   : > { %1431 = shalt.err (!%p1428_p2)
}
  0x23   : > { %s1469_s15 = smov 128   ;;  %s1470_s17 = smov 8  }
  0x24   : > { %1296 = dma.hbm_to_vmem [thread:$0]  (!%p1583_p8), %s1579_s16, 1024, %s1581_s18, %s1588_s20, %s1469_s15, %s1469_s15, %s1470_s17  }
  0x25   : > { %p253_p11 = scmp.lt.s32.totalorder %s1466_s27, 3  ;;  %p1939_p13 = scmp.ge.s32.totalorder %s1466_s27, 1 }
  0x27   : > { %p254_p3 = pnand %p1939_p13, %p253_p11 }
  0x28   : > { %s259_s21 = sand.u32 (!%p254_p3), 1, %s1458_s25  }
  0x29   : > { %257 = sbr.rel (%p254_p3) target bundleno = 969 (0x3c9), region = 48  ;;  %s1234_s22 = sshll.u32 (!%p254_p3), %s259_s21, 6 }
  0x2a   : > { %s260_s23 = scalar_lea.sflag (!%p254_p3), [#allocation4], %s259_s21  ;;  %s1620_s24 = scalar_lea.vmem (!%p254_p3), [#allocation3], %s1234_s22 }
  0x30   : > { %1449 = dma.done.wait (%p1570_p7), %s260_s23, 1024  }
  0x31   : > { %1451 = vsyncadd (%p1570_p7), %s260_s23, 4294966272  ;;  %vm301_vm0 = vcmask 699392   ;;  %v1471_v0 = vmov 0.0   ;;  %vm312_vm1 = vcmask 1041409   ;;  %vm314_vm2 = vcmask 1045509   ;;  %s1472_s27 = smov 55  }
  0x32   : > { %300 = vst [vmem:[#allocation2] sm:$0xff] %v1471_v0  ;;  %302 = vst.msk [vmem:[#allocation2 + $0x8] sm:$0xf] %vm301_vm0, %v1471_v0  ;;  %vm317_vm3 = vcmask 1042434   ;;  %vm319_vm4 = vcmask 1046534   ;;  %vm322_vm5 = vcmask 1043459  }
  0x33   : > { %v353_v1 = vld [vmem:[%s1620_s24 + $0x2] sm:$0x1]  ;;  %v354_v2 = vld [vmem:[%s1620_s24 + $0x12] sm:$0x1]  ;;  %v303_v7 = vld [vmem:[%s1620_s24] sm:$0x1] }
  0x34   : > { %v355_v3 = vld [vmem:[%s1620_s24 + $0x22] sm:$0x1]  ;;  %v356_v4 = vld [vmem:[%s1620_s24 + $0x32] sm:$0x1]  ;;  %v361_v5 = vrot.slane %v354_v2, 7  ;;  %vm324_vm6 = vcmask 1047559  }
  0x35   : > { %v364_v6 = vrot.slane %v355_v3, 6  ;;  %v367_v8 = vrot.slane %v356_v4, 5  ;;  %v304_v9 = vld [vmem:[%s1620_s24 + $0x10] sm:$0x1]  ;;  %v305_v10 = vld [vmem:[%s1620_s24 + $0x20] sm:$0x1] }
  0x36   : > { %v362_v11 = vsel %vm312_vm1, %v361_v5, %v353_v1  ;;  %v306_v12 = vld [vmem:[%s1620_s24 + $0x30] sm:$0x1]  ;;  %v311_v13 = vrot.slane %v304_v9, 7  ;;  %v316_v14 = vrot.slane %v305_v10, 6  ;;  %v375_v15 = vld [vmem:[%s1620_s24 + $0x3] sm:$0x1] }
  0x37   : > { %v363_v16 = vsel %vm314_vm2, %v361_v5, %v362_v11  ;;  %v321_v17 = vrot.slane %v306_v12, 5  ;;  %v376_v18 = vld [vmem:[%s1620_s24 + $0x13] sm:$0x1]  ;;  %v377_v19 = vld [vmem:[%s1620_s24 + $0x23] sm:$0x1]  ;;  %s1473_s10 = smov 19  }
  0x38   : > { %v365_v20 = vsel %vm317_vm3, %v364_v6, %v363_v16  ;;  %v313_v21 = vsel %vm312_vm1, %v311_v13, %v303_v7  ;;  %v378_v22 = vld [vmem:[%s1620_s24 + $0x33] sm:$0x1]  ;;  %v383_v23 = vrot.slane %v376_v18, 7  ;;  %v386_v24 = vrot.slane %v377_v19, 6  ;;  %v331_v25 = vld [vmem:[%s1620_s24 + $0x1] sm:$0x1] }
  0x39   : > { %v366_v26 = vsel %vm319_vm4, %v364_v6, %v365_v20  ;;  %v315_v27 = vsel %vm314_vm2, %v311_v13, %v313_v21  ;;  %v389_v28 = vrot.slane %v378_v22, 5  ;;  %v332_v29 = vld [vmem:[%s1620_s24 + $0x11] sm:$0x1]  ;;  %v333_v30 = vld [vmem:[%s1620_s24 + $0x21] sm:$0x1]  ;;  %s1474_s16 = smov 73  }
  0x3a   : > { %v368_v31 = vsel %vm322_vm5, %v367_v8, %v366_v26  ;;  %v318_v32 = vsel %vm317_vm3, %v316_v14, %v315_v27  ;;  %v384_v33 = vsel %vm312_vm1, %v383_v23, %v375_v15  ;;  %v334_v34 = vld [vmem:[%s1620_s24 + $0x31] sm:$0x1]  ;;  %v339_v35 = vrot.slane %v332_v29, 7  ;;  %v398_v40 = vld [vmem:[%s1620_s24 + $0x14] sm:$0x1]  ;;  %s1475_s18 = smov 37  }
  0x3b   : > { %v369_v36 = vsel %vm324_vm6, %v367_v8, %v368_v31  ;;  %v320_v37 = vsel %vm319_vm4, %v316_v14, %v318_v32  ;;  %v385_v38 = vsel %vm314_vm2, %v383_v23, %v384_v33  ;;  %v342_v39 = vrot.slane %v333_v30, 6  ;;  %v399_v41 = vld [vmem:[%s1620_s24 + $0x24] sm:$0x1]  ;;  %v400_v47 = vld [vmem:[%s1620_s24 + $0x34] sm:$0x1]  ;;  %s1476_s19 = smov 91  }
  0x3c   : > { %370 = vrot.lane.b32.xlu1 %v369_v36, %s1472_s27  ;;  %v323_v42 = vsel %vm322_vm5, %v321_v17, %v320_v37  ;;  %v387_v43 = vsel %vm317_vm3, %v386_v24, %v385_v38  ;;  %v340_v44 = vsel %vm312_vm1, %v339_v35, %v331_v25  ;;  %v345_v45 = vrot.slane %v334_v34, 5  ;;  %v397_v46 = vld [vmem:[%s1620_s24 + $0x4] sm:$0x1]  ;;  %v442_v52 = vld [vmem:[%s1620_s24 + $0x16] sm:$0x1]  ;;  %s1477_s20 = smov 127  }
  0x3d   : > { %v325_v48 = vsel %vm324_vm6, %v321_v17, %v323_v42  ;;  %v388_v49 = vsel %vm319_vm4, %v386_v24, %v387_v43  ;;  %v341_v50 = vsel %vm314_vm2, %v339_v35, %v340_v44  ;;  %v405_v51 = vrot.slane %v398_v40, 7  ;;  %v443_v53 = vld [vmem:[%s1620_s24 + $0x26] sm:$0x1]  ;;  %v444_v59 = vld [vmem:[%s1620_s24 + $0x36] sm:$0x1]  ;;  %s1478_s30 = smov 17  }
  0x3e   : > { %326 = vrot.lane.b32.xlu0 %v325_v48, %s1473_s10  ;;  %v390_v54 = vsel %vm322_vm5, %v389_v28, %v388_v49  ;;  %v343_v55 = vsel %vm317_vm3, %v342_v39, %v341_v50  ;;  %v408_v56 = vrot.slane %v399_v41, 6  ;;  %v411_v57 = vrot.slane %v400_v47, 5  ;;  %v441_v58 = vld [vmem:[%s1620_s24 + $0x6] sm:$0x1]  ;;  %v469_v0 = vld [vmem:[%s1620_s24 + $0x17] sm:$0x1] }
  0x3f   : > { %v391_v60 = vsel %vm324_vm6, %v389_v28, %v390_v54  ;;  %v344_v61 = vsel %vm319_vm4, %v342_v39, %v343_v55  ;;  %v406_v62 = vsel %vm312_vm1, %v405_v51, %v397_v46  ;;  %v449_v63 = vrot.slane %v442_v52, 7  ;;  %v470_v1 = vld [vmem:[%s1620_s24 + $0x27] sm:$0x1]  ;;  %v471_v7 = vld [vmem:[%s1620_s24 + $0x37] sm:$0x1]  ;;  %s1479_s8 = smov 109  }
  0x40   : > { %392 = vrot.lane.b32.xlu1 %v391_v60, %s1474_s16  ;;  %v346_v2 = vsel %vm322_vm5, %v345_v45, %v344_v61  ;;  %v407_v3 = vsel %vm314_vm2, %v405_v51, %v406_v62  ;;  %v452_v4 = vrot.slane %v443_v53, 6  ;;  %v455_v5 = vrot.slane %v444_v59, 5  ;;  %v468_v6 = vld [vmem:[%s1620_s24 + $0x7] sm:$0x1]  ;;  %v420_v12 = vld [vmem:[%s1620_s24 + $0x15] sm:$0x1] }
  0x41   : > { %v347_v8 = vsel %vm324_vm6, %v345_v45, %v346_v2  ;;  %v409_v9 = vsel %vm317_vm3, %v408_v56, %v407_v3  ;;  %v450_v10 = vsel %vm312_vm1, %v449_v63, %v441_v58  ;;  %v476_v11 = vrot.slane %v469_v0, 7  ;;  %v421_v13 = vld [vmem:[%s1620_s24 + $0x25] sm:$0x1]  ;;  %v422_v19 = vld [vmem:[%s1620_s24 + $0x35] sm:$0x1]  ;;  %s1480_s11 = smov 53  }
  0x42   : > { %348 = vrot.lane.b32.xlu0 %v347_v8, %s1475_s18  ;;  %v410_v14 = vsel %vm319_vm4, %v408_v56, %v409_v9  ;;  %v451_v15 = vsel %vm314_vm2, %v449_v63, %v450_v10  ;;  %v479_v16 = vrot.slane %v470_v1, 6  ;;  %v482_v17 = vrot.slane %v471_v7, 5  ;;  %v419_v18 = vld [vmem:[%s1620_s24 + $0x5] sm:$0x1]  ;;  %v513_v24 = vld [vmem:[%s1620_s24 + $0x19] sm:$0x1] }
  0x43   : > { %v412_v20 = vsel %vm322_vm5, %v411_v57, %v410_v14  ;;  %v453_v21 = vsel %vm317_vm3, %v452_v4, %v451_v15  ;;  %v477_v22 = vsel %vm312_vm1, %v476_v11, %v468_v6  ;;  %v427_v23 = vrot.slane %v420_v12, 7  ;;  %v514_v29 = vld [vmem:[%s1620_s24 + $0x29] sm:$0x1]  ;;  %v515_v30 = vld [vmem:[%s1620_s24 + $0x39] sm:$0x1]  ;;  %s1481_s12 = smov 35  }
  0x44   : > { %v413_v25 = vsel %vm324_vm6, %v411_v57, %v412_v20  ;;  %v454_v26 = vsel %vm319_vm4, %v452_v4, %v453_v21  ;;  %v478_v27 = vsel %vm314_vm2, %v476_v11, %v477_v22  ;;  %v430_v28 = vrot.slane %v421_v13, 6  ;;  %v512_v35 = vld [vmem:[%s1620_s24 + $0x9] sm:$0x1]  ;;  %v491_v36 = vld [vmem:[%s1620_s24 + $0x18] sm:$0x1]  ;;  %s1482_s13 = smov 125  }
  0x45   : > { %414 = vrot.lane.b32.xlu1 %v413_v25, %s1476_s19  ;;  %v456_v31 = vsel %vm322_vm5, %v455_v5, %v454_v26  ;;  %v480_v32 = vsel %vm317_vm3, %v479_v16, %v478_v27  ;;  %v428_v33 = vsel %vm312_vm1, %v427_v23, %v419_v18  ;;  %v433_v34 = vrot.slane %v422_v19, 5  ;;  %v492_v41 = vld [vmem:[%s1620_s24 + $0x28] sm:$0x1]  ;;  %v493_v42 = vld [vmem:[%s1620_s24 + $0x38] sm:$0x1]  ;;  %s1483_s14 = smov 71  }
  0x46   : > { %v457_v37 = vsel %vm324_vm6, %v455_v5, %v456_v31  ;;  %v481_v38 = vsel %vm319_vm4, %v479_v16, %v480_v32  ;;  %v429_v39 = vsel %vm314_vm2, %v427_v23, %v428_v33  ;;  %v520_v40 = vrot.slane %v513_v24, 7  ;;  %v490_v47 = vld [vmem:[%s1620_s24 + $0x8] sm:$0x1]  ;;  %v601_v48 = vld [vmem:[%s1620_s24 + $0x1d] sm:$0x1]  ;;  %s1484_s15 = smov 89  }
  0x47   : > { %458 = vrot.lane.b32.xlu0 %v457_v37, %s1477_s20  ;;  %v483_v43 = vsel %vm322_vm5, %v482_v17, %v481_v38  ;;  %v431_v44 = vsel %vm317_vm3, %v430_v28, %v429_v39  ;;  %v523_v45 = vrot.slane %v514_v29, 6  ;;  %v526_v46 = vrot.slane %v515_v30, 5  ;;  %v602_v53 = vld [vmem:[%s1620_s24 + $0x2d] sm:$0x1]  ;;  %v603_v54 = vld [vmem:[%s1620_s24 + $0x3d] sm:$0x1] }
  0x48   : > { %v484_v49 = vsel %vm324_vm6, %v482_v17, %v483_v43  ;;  %v432_v50 = vsel %vm319_vm4, %v430_v28, %v431_v44  ;;  %v521_v51 = vsel %vm312_vm1, %v520_v40, %v512_v35  ;;  %v498_v52 = vrot.slane %v491_v36, 7  ;;  %v600_v59 = vld [vmem:[%s1620_s24 + $0xd] sm:$0x1]  ;;  %v535_v60 = vld [vmem:[%s1620_s24 + $0x1a] sm:$0x1]  ;;  %s1485_s17 = smov 107  }
  0x49   : > { %485 = vrot.lane.b32.xlu1 %v484_v49, %s1478_s30  ;;  %v434_v55 = vsel %vm322_vm5, %v433_v34, %v432_v50  ;;  %v522_v56 = vsel %vm314_vm2, %v520_v40, %v521_v51  ;;  %v501_v57 = vrot.slane %v492_v41, 6  ;;  %v504_v58 = vrot.slane %v493_v42, 5  ;;  %v536_v1 = vld [vmem:[%s1620_s24 + $0x2a] sm:$0x1]  ;;  %v537_v7 = vld [vmem:[%s1620_s24 + $0x3a] sm:$0x1] }
  0x4a   : > { %v435_v61 = vsel %vm324_vm6, %v433_v34, %v434_v55  ;;  %v524_v62 = vsel %vm317_vm3, %v523_v45, %v522_v56  ;;  %v499_v63 = vsel %vm312_vm1, %v498_v52, %v490_v47  ;;  %v608_v0 = vrot.slane %v601_v48, 7  ;;  %v534_v6 = vld [vmem:[%s1620_s24 + $0xa] sm:$0x1]  ;;  %v556_v12 = vld [vmem:[%s1620_s24 + $0xb] sm:$0x1]  ;;  %s1486_s21 = smov 15  }
  0x4b   : > { %436 = vrot.lane.b32.xlu0 %v435_v61, %s1479_s8  ;;  %v525_v2 = vsel %vm319_vm4, %v523_v45, %v524_v62  ;;  %v500_v3 = vsel %vm314_vm2, %v498_v52, %v499_v63  ;;  %v611_v4 = vrot.slane %v602_v53, 6  ;;  %v614_v5 = vrot.slane %v603_v54, 5  ;;  %v557_v13 = vld [vmem:[%s1620_s24 + $0x1b] sm:$0x1]  ;;  %v558_v18 = vld [vmem:[%s1620_s24 + $0x2b] sm:$0x1] }
  0x4c   : > { %v527_v8 = vsel %vm322_vm5, %v526_v46, %v525_v2  ;;  %v502_v9 = vsel %vm317_vm3, %v501_v57, %v500_v3  ;;  %v609_v10 = vsel %vm312_vm1, %v608_v0, %v600_v59  ;;  %v542_v11 = vrot.slane %v535_v60, 7  ;;  %v559_v19 = vld [vmem:[%s1620_s24 + $0x3b] sm:$0x1]  ;;  %v578_v24 = vld [vmem:[%s1620_s24 + $0xc] sm:$0x1]  ;;  %s1487_s22 = smov 33  }
  0x4d   : > { %v528_v14 = vsel %vm324_vm6, %v526_v46, %v527_v8  ;;  %v503_v15 = vsel %vm319_vm4, %v501_v57, %v502_v9  ;;  %v610_v16 = vsel %vm314_vm2, %v608_v0, %v609_v10  ;;  %v545_v17 = vrot.slane %v536_v1, 6  ;;  %v579_v25 = vld [vmem:[%s1620_s24 + $0x1c] sm:$0x1]  ;;  %v580_v30 = vld [vmem:[%s1620_s24 + $0x2c] sm:$0x1]  ;;  %s1488_s23 = smov 126  }
  0x4e   : > { %529 = vrot.lane.b32.xlu1 %v528_v14, %s1480_s11  ;;  %v505_v20 = vsel %vm322_vm5, %v504_v58, %v503_v15  ;;  %v612_v21 = vsel %vm317_vm3, %v611_v4, %v610_v16  ;;  %v543_v22 = vsel %vm312_vm1, %v542_v11, %v534_v6  ;;  %v548_v23 = vrot.slane %v537_v7, 5  ;;  %v581_v31 = vld [vmem:[%s1620_s24 + $0x3c] sm:$0x1]  ;;  %v627_v36 = vld [vmem:[%s1620_s24 + $0xe] sm:$0x1]  ;;  %s1490_s27 = smov 110  }
  0x4f   : > { %v506_v26 = vsel %vm324_vm6, %v504_v58, %v505_v20  ;;  %v613_v27 = vsel %vm319_vm4, %v611_v4, %v612_v21  ;;  %v544_v28 = vsel %vm314_vm2, %v542_v11, %v543_v22  ;;  %v564_v29 = vrot.slane %v557_v13, 7  ;;  %v628_v37 = vld [vmem:[%s1620_s24 + $0x1e] sm:$0x1]  ;;  %v629_v38 = vld [vmem:[%s1620_s24 + $0x2e] sm:$0x1]  ;;  %s1491_s10 = smov 108  }
  0x50   : > { %507 = vrot.lane.b32.xlu0 %v506_v26, %s1481_s12  ;;  %v615_v32 = vsel %vm322_vm5, %v614_v5, %v613_v27  ;;  %v546_v33 = vsel %vm317_vm3, %v545_v17, %v544_v28  ;;  %v567_v34 = vrot.slane %v558_v18, 6  ;;  %v570_v35 = vrot.slane %v559_v19, 5  ;;  %v630_v43 = vld [vmem:[%s1620_s24 + $0x3e] sm:$0x1]  ;;  %v650_v44 = vld [vmem:[%s1620_s24 + $0x1f] sm:$0x1] }
  0x51   : > { %v616_v39 = vsel %vm324_vm6, %v614_v5, %v615_v32  ;;  %v547_v40 = vsel %vm319_vm4, %v545_v17, %v546_v33  ;;  %v565_v41 = vsel %vm312_vm1, %v564_v29, %v556_v12  ;;  %v586_v42 = vrot.slane %v579_v25, 7  ;;  %v649_v49 = vld [vmem:[%s1620_s24 + $0xf] sm:$0x1]  ;;  %v652_v59 = vld [vmem:[%s1620_s24 + $0x3f] sm:$0x1]  ;;  %p294_p7 = scmp.lt.s32.totalorder %s1553_s28, 1 }
  0x52   : > { %617 = vrot.lane.b32.xlu1 %v616_v39, %s1482_s13  ;;  %v549_v45 = vsel %vm322_vm5, %v548_v23, %v547_v40  ;;  %v566_v46 = vsel %vm314_vm2, %v564_v29, %v565_v41  ;;  %v589_v47 = vrot.slane %v580_v30, 6  ;;  %v592_v48 = vrot.slane %v581_v31, 5  ;;  %v651_v50 = vld [vmem:[%s1620_s24 + $0x2f] sm:$0x1]  ;;  %s1489_s24 = smov 92  }
  0x53   : > { %v550_v51 = vsel %vm324_vm6, %v548_v23, %v549_v45  ;;  %v568_v52 = vsel %vm317_vm3, %v567_v34, %v566_v46  ;;  %v587_v53 = vsel %vm312_vm1, %v586_v42, %v578_v24  ;;  %v635_v54 = vrot.slane %v628_v37, 7  ;;  %s1945_s28 = smov (!%p294_p7, %s1553_s28), 1 }
  0x54   : > { %551 = vrot.lane.b32.xlu0 %v550_v51, %s1483_s14  ;;  %v569_v55 = vsel %vm319_vm4, %v567_v34, %v568_v52  ;;  %v588_v56 = vsel %vm314_vm2, %v586_v42, %v587_v53  ;;  %v638_v57 = vrot.slane %v629_v38, 6  ;;  %v641_v58 = vrot.slane %v630_v43, 5  ;;  %v932_v51 = vld [vmem:[%s1931_s2 + $0x18] sm:$0xff]  ;;  %v931_v52 = vld [vmem:[%s1931_s2 + $0x10] sm:$0xff] }
  0x55   : > { %v571_v60 = vsel %vm322_vm5, %v570_v35, %v569_v55  ;;  %v590_v61 = vsel %vm317_vm3, %v589_v47, %v588_v56  ;;  %v636_v62 = vsel %vm312_vm1, %v635_v54, %v627_v36  ;;  %v657_v63 = vrot.slane %v650_v44, 7  ;;  %v1814_v44 = vld [vmem:[%s1930_s1] sm:$0xff]   ;;  %v968_v53 = vld [vmem:[%s1932_s3 + $0x18] sm:$0xff] }
  0x56   : > { %v572_v0 = vsel %vm324_vm6, %v570_v35, %v571_v60  ;;  %v591_v1 = vsel %vm319_vm4, %v589_v47, %v590_v61  ;;  %v637_v2 = vsel %vm314_vm2, %v635_v54, %v636_v62  ;;  %v660_v3 = vrot.slane %v651_v50, 6  ;;  %v930_v47 = vld [vmem:[%s1931_s2 + $0x8] sm:$0xff]  ;;  %v965_v50 = vld [vmem:[%s1932_s3] sm:$0xff]  ;;  %v967_v54 = vld [vmem:[%s1932_s3 + $0x10] sm:$0xff] }
  0x57   : > { %v593_v4 = vsel %vm322_vm5, %v592_v48, %v591_v1  ;;  %v639_v5 = vsel %vm317_vm3, %v638_v57, %v637_v2  ;;  %v658_v6 = vsel %vm312_vm1, %v657_v63, %v649_v49  ;;  %v663_v7 = vrot.slane %v652_v59, 5  ;;  %v966_v49 = vld [vmem:[%s1932_s3 + $0x8] sm:$0xff] }
  0x58   : > { %573 = vrot.lane.b32.xlu0 %v572_v0, %s1484_s15  ;;  %v594_v8 = vsel %vm324_vm6, %v592_v48, %v593_v4  ;;  %v640_v9 = vsel %vm319_vm4, %v638_v57, %v639_v5  ;;  %v659_v10 = vsel %vm314_vm2, %v657_v63, %v658_v6  ;;  %vm329_vm7 = vcmask 281752   ;;  %v929_v48 = vld [vmem:[%s1931_s2] sm:$0xff]  ;;  %s1249_s15 = sshll.u32 %s1945_s28, 4 }
  0x59   : > { %595 = vrot.lane.b32.xlu1 %v594_v8, %s1485_s17  ;;  %v642_v11 = vsel %vm322_vm5, %v641_v58, %v640_v9  ;;  %v661_v12 = vsel %vm317_vm3, %v660_v3, %v659_v10  ;;  %vm351_vm8 = vcmask 429352   ;;  %vm373_vm9 = vcmask 576952  }
  0x5a   : > { %v643_v13 = vsel %vm324_vm6, %v641_v58, %v642_v11  ;;  %v662_v14 = vsel %vm319_vm4, %v660_v3, %v661_v12  ;;  %vm395_vm10 = vcmask 724552   ;;  %vm417_vm11 = vcmask 872152  }
  0x5b   : > { %v664_v15 = vsel %vm322_vm5, %v663_v7, %v662_v14  ;;  %vm464_vm12 = vcmask 1044472   ;;  %vm465_vm13 = vcmask 121860   ;;  %vm461_vm14 = vcmask 1039360  }
  0x5c   : > { %644 = vrot.lane.b32.xlu0 %v643_v13, %s1486_s21  ;;  %v665_v16 = vsel %vm324_vm6, %v663_v7, %v664_v15  ;;  %vm439_vm15 = vcmask 1019752   ;;  %vm466_vm0 = vmor %vm465_vm13, %vm464_vm12  ;;  %vm488_vm1 = vcmask 265352   ;;  %vm510_vm2 = vcmask 412952  }
  0x5d   : > { %666 = vrot.lane.b32.xlu1 %v665_v16, %s1487_s22  ;;  %vm532_vm3 = vcmask 560552   ;;  %vm554_vm4 = vcmask 708152   ;;  %vm623_vm5 = vcmask 1044456   ;;  %vm624_vm6 = vcmask 105476  }
  0x5e   : > { %vm669_vm12 = vcmask 396552   ;;  %vm810_vm13 = vcmask 293888   ;;  %v1492_v45 = vmov 0  }
  0x5f   : > { %1267 = vmatprep.mubr.msk.bf16.mxu1 %vm810_vm13, %v1814_v44  ;;  %859 = vmatprep.mubr.bf16.mxu0 %v1492_v45 }
  0x60   : > { %1396 = vset.pattern.permute.xlu1 %v1492_v45  ;;  %1395 = vset.pattern.permute.xlu0 %v1492_v45 }
  0xae   : > { %v371_v17 = vpop.permute.xlu1 %370 }
  0xb0   : > { %v327_v18 = vpop.permute.xlu0 %326 }
  0xb1   : > { %330 = vst.msk [vmem:[#allocation2] sm:$0xf] %vm329_vm7, %v327_v18  ;;  %vm576_vm7 = vcmask 855752  }
  0xb2   : > { %v393_v19 = vpop.permute.xlu1 %392 }
  0xb4   : > { %v349_v20 = vpop.permute.xlu0 %348 }
  0xb5   : > { %352 = vst.msk [vmem:[#allocation2] sm:$0xf] %vm351_vm8, %v349_v20  ;;  %vm620_vm8 = vcmask 1022976  }
  0xb6   : > { %374 = vst.msk [vmem:[#allocation2] sm:$0xf] %vm373_vm9, %v371_v17  ;;  %vm598_vm9 = vcmask 1003352  }
  0xb7   : > { %v415_v21 = vpop.permute.xlu1 %414  ;;  %396 = vst.msk [vmem:[#allocation2] sm:$0xf] %vm395_vm10, %v393_v19  ;;  %vm625_vm10 = vmor %vm624_vm6, %vm623_vm5  ;;  %vm768_vm5 = vcmask 736256   ;;  %vm817_vm6 = vcmask 1041408  }
  0xb8   : > { %418 = vst.msk [vmem:[#allocation2] sm:$0xf] %vm417_vm11, %v415_v21  ;;  %vm647_vm11 = vcmask 248952  }
  0xb9   : > { %v459_v22 = vpop.permute.xlu0 %458 }
  0xba   : > { %v460_v23 = vrot.slane %v459_v22, 4 }
  0xbb   : > { %v486_v24 = vpop.permute.xlu1 %485 }
  0xbc   : > { %v462_v26 = vsel %vm461_vm14, %v460_v23, %v459_v22 }
  0xbd   : > { %v437_v25 = vpop.permute.xlu0 %436 }
  0xbe   : > { %440 = vst.msk [vmem:[#allocation2] sm:$0xf] %vm439_vm15, %v437_v25  ;;  %vm696_vm15 = vcmask 1031168  }
  0xbf   : > { %467 = vst.msk [vmem:[#allocation2] sm:$0xff] %vm466_vm0, %v462_v26  ;;  %vm774_vm0 = vcmask 1043456  }
  0xc0   : > { %v530_v27 = vpop.permute.xlu1 %529  ;;  %489 = vst.msk [vmem:[#allocation2 + $0x4] sm:$0xf] %vm488_vm1, %v486_v24  ;;  %vm708_vm1 = vcmask 900096  }
  0xc2   : > { %v508_v28 = vpop.permute.xlu0 %507 }
  0xc3   : > { %511 = vst.msk [vmem:[#allocation2 + $0x4] sm:$0xf] %vm510_vm2, %v508_v28  ;;  %vm732_vm2 = vcmask 883712  }
  0xc4   : > { %533 = vst.msk [vmem:[#allocation2 + $0x4] sm:$0xf] %vm532_vm3, %v530_v27  ;;  %v618_v29 = vpop.permute.xlu1 %617  ;;  %vm744_vm3 = vcmask 752640  }
  0xc5   : > { %v619_v31 = vrot.slane %v618_v29, 4 }
  0xc6   : > { %v552_v30 = vpop.permute.xlu0 %551 }
  0xc7   : > { %555 = vst.msk [vmem:[#allocation2 + $0x4] sm:$0xf] %vm554_vm4, %v552_v30  ;;  %v621_v34 = vsel %vm620_vm8, %v619_v31, %v618_v29  ;;  %vm756_vm4 = vcmask 744448   ;;  %vm1158_vm8 = vcmask 1024  }
  0xca   : > { %v574_v32 = vpop.permute.xlu0 %573 }
  0xcb   : > { %577 = vst.msk [vmem:[#allocation2 + $0x4] sm:$0xf] %vm576_vm7, %v574_v32  ;;  %v596_v33 = vpop.permute.xlu1 %595  ;;  %vm1043_vm7 = vcmask 261120  }
  0xcc   : > { %599 = vst.msk [vmem:[#allocation2 + $0x4] sm:$0xf] %vm598_vm9, %v596_v33  ;;  %vm1156_vm9 = vcmask 7168  }
  0xcd   : > { %626 = vst.msk [vmem:[#allocation2 + $0x4] sm:$0xff] %vm625_vm10, %v621_v34 }
  0xce   : > { %v645_v35 = vpop.permute.xlu0 %644 }
  0xcf   : > { %648 = vst.msk [vmem:[#allocation2 + $0x8] sm:$0xf] %vm647_vm11, %v645_v35  ;;  %v667_v36 = vpop.permute.xlu1 %666 }
  0xd0   : > { %670 = vst.msk [vmem:[#allocation2 + $0x8] sm:$0xf] %vm669_vm12, %v667_v36 }
  0xd4   : > { %v1790_v37 = vld [vmem:[#allocation2] sm:$0xff] }
  0xd5   : > { %690 = vrot.lane.b32.xlu0 %v1790_v37, %s1488_s23  ;;  %v1795_v38 = vcombine.high %v1790_v37, %v1790_v37  ;;  %v677_v41 = vcombine.low %v1790_v37, %v1790_v37 }
  0xd7   : > { %v1797_v39 = vld [vmem:[#allocation2 + $0x8] sm:$0xf]  ;;  %v1390_v46 = vpack.i.bf16 %v1795_v38, %v1790_v37 }
  0xd8   : > { %v1360_v40 = vpack.i.bf16 %v1797_v39, %v1795_v38  ;;  %v678_v42 = vcombine.low %v1797_v39, %v1797_v39 }
  0xda   : > { %1361 = vrot.lane.b32.xlu0 %v1360_v40, %s1479_s8  ;;  %1356 = vrot.lane.b32.xlu1 %v1360_v40, %s1488_s23  ;;  %v1370_v43 = vpack.i.bf16 %v678_v42, %v1790_v37 }
  0xde   : > { %1366 = vrot.lane.b32.xlu0 %v1360_v40, %s1489_s24  ;;  %679 = vrot.lane.b32.xlu1 %v677_v41, %s1477_s20 }
  0xe2   : > { %702 = vrot.lane.b32.xlu1 %v677_v41, %s1490_s27  ;;  %1371 = vrot.lane.b32.xlu0 %v1370_v43, %s1477_s20  ;;  %s1493_s20 = smov 90  }
  0xe6   : > { %726 = vrot.lane.b32.xlu1 %v677_v41, %s1491_s10  ;;  %1376 = vrot.lane.b32.xlu0 %v1370_v43, %s1490_s27  ;;  %s298_s27 = scalar_lea.vmem %s1936_s7, %s1249_s15 }
  0xea   : > { %1381 = vrot.lane.b32.xlu1 %v1370_v43, %s1491_s10  ;;  %714 = vrot.lane.b32.xlu0 %v1790_v37, %s1479_s8 }
  0xee   : > { %1386 = vrot.lane.b32.xlu1 %v1370_v43, %s1476_s19  ;;  %738 = vrot.lane.b32.xlu0 %v1790_v37, %s1489_s24 }
  0xf2   : > { %750 = vrot.lane.b32.xlu1 %v677_v41, %s1476_s19  ;;  %1391 = vrot.lane.b32.xlu0 %v1390_v46, %s1493_s20 }
  0xf6   : > { %766 = vrot.lane.b32.xlu1 %v1797_v39, %s1493_s20  ;;  %935 = vperm.xlu0 %1395, %v929_v48  }
  0xfa   : > { %940 = vperm.xlu1 %1396, %v930_v47   ;;  %976 = vperm.xlu0 %1395, %v966_v49  }
  0xfe   : > { %971 = vperm.xlu1 %1396, %v965_v50   ;;  %950 = vperm.xlu0 %1395, %v932_v51  }
 0x102   : > { %945 = vperm.xlu1 %1396, %v931_v52   ;;  %986 = vperm.xlu0 %1395, %v968_v53  }
 0x106   : > { %981 = vperm.xlu1 %1396, %v967_v54  }
 0x147   : > { %v691_v55 = vpop.permute.xlu0 %690 }
 0x14c   : > { %v1362_v56 = vpop.permute.xlu0 %1361  ;;  %v1357_v57 = vpop.permute.xlu1 %1356 }
 0x14d   : > { %v1359_v0 = vunpack.i.h.bf16 %v1357_v57  ;;  %v1358_v1 = vunpack.i.l.bf16 %v1357_v57  ;;  %v1364_v7 = vunpack.i.h.bf16 %v1362_v56  ;;  %v1363_v25 = vunpack.i.l.bf16 %v1362_v56 }
 0x14f   : > { %v698_v8 = vsel %vm696_vm15, %v1358_v1, %v1359_v0  ;;  %v697_v10 = vsel %vm696_vm15, %v691_v55, %v1358_v1 }
 0x150   : > { %v1367_v58 = vpop.permute.xlu0 %1366  ;;  %v680_v59 = vpop.permute.xlu1 %679 }
 0x151   : > { %v1369_v26 = vunpack.i.h.bf16 %v1367_v58  ;;  %v1368_v27 = vunpack.i.l.bf16 %v1367_v58 }
 0x153   : > { %v746_v36 = vsel %vm744_vm3, %v1368_v27, %v1369_v26 }
 0x154   : > { %v703_v60 = vpop.permute.xlu1 %702  ;;  %v1372_v61 = vpop.permute.xlu0 %1371 }
 0x155   : > { %v1374_v62 = vunpack.i.h.bf16 %v1372_v61  ;;  %v1373_v63 = vunpack.i.l.bf16 %v1372_v61 }
 0x157   : > { %v686_v6 = vsel %vm461_vm14, %v1373_v63, %v1374_v62  ;;  %v685_v9 = vsel %vm461_vm14, %v680_v59, %v1373_v63  ;;  %v777_v11 = vsel %vm774_vm0, %v1797_v39, %v1374_v62  ;;  %vm720_vm14 = vcmask 891904   ;;  %v1401_v63 = vld [vmem:[%s1930_s1 + $0x8] sm:$0xff]  }
 0x158   : > { %v727_v2 = vpop.permute.xlu1 %726  ;;  %v1377_v3 = vpop.permute.xlu0 %1376  ;;  %v776_v18 = vsel %vm774_vm0, %v1795_v38, %v686_v6  ;;  %v775_v24 = vsel %vm774_vm0, %v1790_v37, %v685_v9  ;;  %v722_v34 = vsel %vm720_vm14, %v1363_v25, %v1364_v7 }
 0x159   : > { %v1379_v4 = vunpack.i.h.bf16 %v1377_v3  ;;  %v1378_v5 = vunpack.i.l.bf16 %v1377_v3  ;;  %v1015_v3 = vlaneseq }
 0x15b   : > { %v780_v12 = vsel %vm774_vm0, %v1359_v0, %v1379_v4  ;;  %v710_v13 = vsel %vm708_vm1, %v1378_v5, %v1379_v4  ;;  %v709_v14 = vsel %vm708_vm1, %v703_v60, %v1378_v5  ;;  %v1016_v6 = vshrl.u32 %v1015_v3, 7 }
 0x15c   : > { %v1382_v15 = vpop.permute.xlu1 %1381  ;;  %v715_v16 = vpop.permute.xlu0 %714  ;;  %v789_v17 = vpack.c.bf16 %v780_v12, %v777_v11  ;;  %v779_v19 = vsel %vm774_vm0, %v698_v8, %v710_v13  ;;  %v778_v20 = vsel %vm774_vm0, %v697_v10, %v709_v14  ;;  %v1013_v12 = vld [vmem:[%s1935_s6] sm:$0x7] }
 0x15d   : > { %v1384_v21 = vunpack.i.h.bf16 %v1382_v15  ;;  %v1383_v22 = vunpack.i.l.bf16 %v1382_v15  ;;  %v788_v23 = vpack.c.bf16 %v779_v19, %v776_v18  ;;  %v787_v28 = vpack.c.bf16 %v778_v20, %v775_v24 }
 0x15e   : > { %1261 = vmatprep.subr.bf16.mxu1 %v789_v17  ;;  %v721_v35 = vsel %vm720_vm14, %v715_v16, %v1363_v25  ;;  %v1017_v8 = vsub.s32 0, %v1016_v6  ;;  %v1025_v9 = vsub.s32 2, %v1016_v6 }
 0x15f   : > { %827 = vmatprep.subr.bf16.mxu0 %v788_v23  ;;  %1262 = vmatpush3.bf16.msra.mxu1 %v789_v17  ;;  %v734_v31 = vsel %vm732_vm2, %v1383_v22, %v1384_v21  ;;  %v733_v37 = vsel %vm732_vm2, %v727_v2, %v1383_v22  ;;  %v783_v39 = vsel %vm774_vm0, %v1364_v7, %v1384_v21 }
 0x160   : > { %v1387_v29 = vpop.permute.xlu1 %1386  ;;  %v739_v30 = vpop.permute.xlu0 %738  ;;  %828 = vmatpush1.bf16.msra.mxu0 %v787_v28  ;;  %v782_v47 = vsel %vm774_vm0, %v722_v34, %v734_v31  ;;  %v781_v53 = vsel %vm774_vm0, %v721_v35, %v733_v37  ;;  %v1887_v19 = vrot.slane %v1013_v12, %v1017_v8  ;;  %v1026_v23 = vrot.slane %v1013_v12, %v1025_v9 }
 0x161   : > { %v1389_v32 = vunpack.i.h.bf16 %v1387_v29  ;;  %v1388_v33 = vunpack.i.l.bf16 %v1387_v29  ;;  %v745_v41 = vsel %vm744_vm3, %v739_v30, %v1368_v27 }
 0x163   : > { %v758_v38 = vsel %vm756_vm4, %v1388_v33, %v1389_v32  ;;  %v786_v40 = vsel %vm774_vm0, %v1369_v26, %v1389_v32 }
 0x164   : > { %v751_v42 = vpop.permute.xlu1 %750  ;;  %v1392_v43 = vpop.permute.xlu0 %1391  ;;  %v792_v46 = vpack.c.bf16 %v786_v40, %v783_v39  ;;  %v785_v48 = vsel %vm774_vm0, %v746_v36, %v758_v38 }
 0x165   : > { %v757_v49 = vsel %vm756_vm4, %v751_v42, %v1388_v33  ;;  %v1394_v50 = vunpack.i.h.bf16 %v1392_v43  ;;  %v1393_v51 = vunpack.i.l.bf16 %v1392_v43  ;;  %v791_v52 = vpack.c.bf16 %v785_v48, %v782_v47 }
 0x166   : > { %v784_v54 = vsel %vm774_vm0, %v745_v41, %v757_v49  ;;  %1263 = vmatprep.subr.bf16.mxu1 %v792_v46 }
 0x167   : > { %829 = vmatprep.subr.bf16.mxu0 %v791_v52  ;;  %1264 = vmatpush3.bf16.msra.mxu1 %v792_v46  ;;  %v790_v55 = vpack.c.bf16 %v784_v54, %v781_v53  ;;  %v769_v56 = vsel %vm768_vm5, %v1393_v51, %v1394_v50 }
 0x168   : > { %v767_v57 = vpop.permute.xlu1 %766  ;;  %v793_v58 = vpack.c.bf16 %v769_v56, %v769_v56 }
 0x169   : > { %v770_v59 = vsel %vm768_vm5, %v1394_v50, %v767_v57  ;;  %v795_v60 = vpack.c.bf16 %v767_v57, %v767_v57  ;;  %830 = vmatpush1.bf16.msra.mxu0 %v790_v55 }
 0x16a   : > { %v794_v61 = vpack.c.bf16 %v770_v59, %v770_v59  ;;  %v819_v0 = vsel %vm817_vm6, %v793_v58, 0 }
 0x16b   : > { %1290 = vmatprep.subr.msk.bf16.mxu1 %vm817_vm6, %v795_v60  ;;  %v825_v62 = vsel %vm817_vm6, %v795_v60, 0 }
 0x16c   : > { %1239 = vmatprep.subr.msk.bf16.mxu0 %vm817_vm6, %v794_v61  ;;  %1266 = vmatpush3.bf16.msra.mxu1 %v825_v62 }
 0x16d   : > { %832 = vmatpush1.bf16.msra.mxu0 %v819_v0 }
 0x16f   : > { %1268 = vmatmul.mubr.msk.bf16.vlgmr.msra.gmra.mrb[0].mxu1 %vm810_vm13, %v1401_v63 }
 0x170   : > { %1240 = vmatmul.mubr.msk.bf16.vlgmr.msra.gmra.mrb[0].mxu0 %vm810_vm13, %v1814_v44 }
 0x171   : > { %869 = vmatprep.mubr.bf16.mxu0 %v1492_v45  ;;  %v1021_v45 = vsub.s32 1, %v1016_v6 }
 0x173   : > { %v1022_v31 = vrot.slane %v1013_v12, %v1021_v45 }
 0x175   : > { %v936_v2 = vpop.permute.xlu0 %935 }
 0x178   : > { %1241 = vmatmul.mubr.msk.bf16.gmra.mrb[4].mxu0 %vm810_vm13, %v1401_v63 }
 0x179   : > { %v941_v1 = vpop.permute.xlu1 %940  ;;  %v977_v5 = vpop.permute.xlu0 %976 }
 0x17d   : > { %v972_v4 = vpop.permute.xlu1 %971  ;;  %v951_v10 = vpop.permute.xlu0 %950 }
 0x181   : > { %v946_v7 = vpop.permute.xlu1 %945  ;;  %v987_v47 = vpop.permute.xlu0 %986 }
 0x185   : > { %v982_v26 = vpop.permute.xlu1 %981 }
 0x242   : > { %v1269_v11 = vpop.f32.mrb[0].mxu1 }
 0x243   : > { %v861_v44 = vpop.f32.mrb[0].mxu0  ;;  %v914_v13 = vpop.f32.mrb[1].mxu1  ;;  %v961_v18 = vmul.f32 %v1269_v11, %v946_v7 }
 0x244   : > { %v953_v14 = vmul.f32 %v936_v2, %v861_v44  ;;  %v955_v15 = vmul.f32 %v936_v2, %v914_v13  ;;  %v863_v16 = vpop.f32.mrb[1].mxu0  ;;  %v1270_v17 = vpop.f32.mrb[2].mxu1 }
 0x245   : > { %v954_v20 = vmul.f32 %v936_v2, %v863_v16  ;;  %v865_v21 = vpop.f32.mrb[2].mxu0  ;;  %v917_v22 = vpop.f32.mrb[3].mxu1  ;;  %v964_v32 = vmul.f32 %v1270_v17, %v951_v10  ;;  %v997_v38 = vadd.f32 %v982_v26, %v961_v18 }
 0x246   : > { %v989_v24 = vadd.f32 %v972_v4, %v953_v14  ;;  %v991_v25 = vadd.f32 %v972_v4, %v955_v15  ;;  %v956_v27 = vmul.f32 %v941_v1, %v865_v21  ;;  %v958_v28 = vmul.f32 %v941_v1, %v917_v22  ;;  %v867_v29 = vpop.f32.mrb[3].mxu0 }
 0x247   : > { %v990_v30 = vadd.f32 %v972_v4, %v954_v20  ;;  %v957_v33 = vmul.f32 %v941_v1, %v867_v29  ;;  %v1000_v51 = vadd.f32 %v987_v47, %v964_v32  ;;  %v1009_v60 = vmax.f32 %v997_v38, 0.0 }
 0x248   : > { %v1001_v34 = vmax.f32 %v989_v24, 0.0  ;;  %v1003_v35 = vmax.f32 %v991_v25, 0.0  ;;  %v992_v36 = vadd.f32 %v977_v5, %v956_v27  ;;  %v994_v37 = vadd.f32 %v977_v5, %v958_v28 }
 0x249   : > { %v1002_v39 = vmax.f32 %v990_v30, 0.0  ;;  %v993_v40 = vadd.f32 %v977_v5, %v957_v33  ;;  %v1012_v5 = vmax.f32 %v1000_v51, 0.0  ;;  %v1038_v45 = vmul.f32 %v1026_v23, %v1009_v60 }
 0x24a   : > { %v1030_v41 = vmul.f32 %v1887_v19, %v1001_v34  ;;  %v1004_v42 = vmax.f32 %v992_v36, 0.0  ;;  %v1006_v43 = vmax.f32 %v994_v37, 0.0  ;;  %v1032_v46 = vmul.f32 %v1026_v23, %v1003_v35  ;;  %v1072_v35 = vld [vmem:[%s1933_s4 + $0x8] sm:$0x3]  ;;  %v1073_v37 = vld [vmem:[%s1934_s5] sm:$0xff] }
 0x24b   : > { %v1031_v48 = vmul.f32 %v1022_v31, %v1002_v39  ;;  %v1005_v49 = vmax.f32 %v993_v40, 0.0  ;;  %v871_v50 = vpop.f32.mrb[4].mxu0  ;;  %v1041_v16 = vmul.f32 %v1026_v23, %v1012_v5  ;;  %v1054_v20 = vsel %vm1043_vm7, %v1038_v45, 0.0  ;;  %v1074_v36 = vld [vmem:[%s1934_s5 + $0x8] sm:$0x3] }
 0x24c   : > { %v1033_v52 = vmul.f32 %v1887_v19, %v1004_v42  ;;  %v959_v53 = vmul.f32 %v946_v7, %v871_v50  ;;  %v873_v54 = vpop.f32.mrb[5].mxu0  ;;  %v1035_v55 = vmul.f32 %v1026_v23, %v1006_v43  ;;  %v1044_v0 = vsel %vm1043_vm7, %v1032_v46, 0.0 }
 0x24d   : > { %v1034_v56 = vmul.f32 %v1022_v31, %v1005_v49  ;;  %v960_v57 = vmul.f32 %v946_v7, %v873_v54  ;;  %v875_v58 = vpop.f32.mrb[6].mxu0  ;;  %v1042_v59 = vadd.f32 %v1031_v48, %v1030_v41  ;;  %v1059_v24 = vsel %vm1043_vm7, %v1041_v16, 0.0 }
 0x24e   : > { %v995_v61 = vadd.f32 %v982_v26, %v959_v53  ;;  %v962_v62 = vmul.f32 %v951_v10, %v875_v58  ;;  %v877_v63 = vpop.f32.mrb[7].mxu0  ;;  %v1049_v9 = vsel %vm1043_vm7, %v1035_v55, 0.0 }
 0x24f   : > { %v996_v1 = vadd.f32 %v982_v26, %v960_v57  ;;  %v963_v2 = vmul.f32 %v951_v10, %v877_v63  ;;  %v1045_v3 = vadd.f32 %v1044_v0, %v1042_v59  ;;  %v1048_v4 = vadd.f32 %v1034_v56, %v1033_v52  ;;  %v1071_v26 = vld [vmem:[%s1933_s4] sm:$0xff] }
 0x250   : > { %v1007_v6 = vmax.f32 %v995_v61, 0.0  ;;  %v998_v8 = vadd.f32 %v987_v47, %v962_v62  ;;  %1279 = vmatprep.mubr.msk.f32.mxu1 %vm1043_vm7, %v1071_v26 }
 0x251   : > { %v1008_v11 = vmax.f32 %v996_v1, 0.0  ;;  %v999_v12 = vadd.f32 %v987_v47, %v963_v2  ;;  %1046 = vadd.xlane.f32.xlu1 %v1045_v3  ;;  %v1050_v7 = vadd.f32 %v1049_v9, %v1048_v4 }
 0x252   : > { %v1036_v44 = vmul.f32 %v1887_v19, %v1007_v6  ;;  %v1010_v13 = vmax.f32 %v998_v8, 0.0 }
 0x253   : > { %v1037_v14 = vmul.f32 %v1022_v31, %v1008_v11  ;;  %v1011_v15 = vmax.f32 %v999_v12, 0.0  ;;  %1051 = vadd.xlane.f32.xlu0 %v1050_v7 }
 0x254   : > { %v1039_v10 = vmul.f32 %v1887_v19, %v1010_v13 }
 0x255   : > { %v1040_v17 = vmul.f32 %v1022_v31, %v1011_v15  ;;  %v1053_v18 = vadd.f32 %v1037_v14, %v1036_v44 }
 0x257   : > { %v1055_v21 = vadd.f32 %v1054_v20, %v1053_v18  ;;  %v1058_v22 = vadd.f32 %v1040_v17, %v1039_v10 }
 0x259   : > { %1056 = vadd.xlane.f32.xlu0 %v1055_v21  ;;  %v1060_v25 = vadd.f32 %v1059_v24, %v1058_v22 }
 0x25b   : > { %1061 = vadd.xlane.f32.xlu1 %v1060_v25 }
 0x2de   : > { %v1047_v27 = vpop.xlane.xlu1 %1046 }
 0x2df   : > { %v1067_v23 = vmul.f32 0.00390625, %v1047_v27 }
 0x2e0   : > { %v1052_v19 = vpop.xlane.xlu0 %1051 }
 0x2e1   : > { %v1068_v28 = vmul.f32 0.00390625, %v1052_v19 }
 0x2e3   : > { %v1282_v29 = vpack.c.bf16 %v1068_v28, %v1067_v23 }
 0x2e5   : > { %1283 = vmatprep.subr.bf16.mxu1 %v1282_v29 }
 0x2e6   : > { %1285 = vmatpush3.bf16.msra.mxu1 %v1282_v29  ;;  %v1057_v30 = vpop.xlane.xlu0 %1056 }
 0x2e7   : > { %v1069_v32 = vmul.f32 0.00390625, %v1057_v30 }
 0x2e8   : > { %v1062_v31 = vpop.xlane.xlu1 %1061 }
 0x2e9   : > { %v1070_v33 = vmul.f32 0.00390625, %v1062_v31 }
 0x2eb   : > { %v1286_v34 = vpack.c.bf16 %v1070_v33, %v1069_v32 }
 0x2ed   : > { %1287 = vmatprep.subr.bf16.mxu1 %v1286_v34 }
 0x2ee   : > { %1289 = vmatpush3.bf16.msra.mxu1 %v1286_v34 }
 0x2f1   : > { %1280 = vmatmul.mubr.msk.f32.vlgmr.msra.gmra.mrb[4].mxu1 %vm1043_vm7, %v1072_v35 }
 0x3c4   : > { %v1281_v38 = vpop.f32.mrb[4].mxu1 }
 0x3c5   : > { %v1153_v39 = vadd.f32 %v1281_v38, %v1074_v36  ;;  %v1147_v40 = vpop.f32.mrb[5].mxu1 }
 0x3c6   : > { %v1148_v41 = vadd.f32 %v1147_v40, %v1073_v37 }
 0x3c7   : > { %1159 = vst.msk [vmem:[%s298_s27 + $0x8] sm:$0x3] %vm1158_vm8, %v1153_v39 }
 0x3c8   : > { %1157 = vst.msk [vmem:[%s298_s27] sm:$0xff] %vm1156_vm9, %v1148_v41 }
 0x3c9 PF: > { %p17_p8 = scmp.ge.s32.totalorder %s1556_s29, 4   ;;  %s1940_s24 = smov %s1458_s25 }
 0x3ca   : > { %s1941_s25 = smov %s1462_s26  ;;  %s1942_s26 = smov %s1566_s9 }
 0x3cb   : > { %s1943_s27 = smov %s1556_s29  ;;  %19 = sbr.rel (!%p17_p8) target bundleno = 3 (0x3), region = 88 }
 0x3d2   :  { %1181 = vsyncpa [#allocation4], 1 }
 0x3d3   :  { %1183 = vsyncpa [#allocation4 + $0x1], 1 }

</bundles_post_ra>
